<compile_context>
chip_gen: v5e
topology: v5e:2x2
jax: 0.10.0
libtpu: 0.0.40
codegen_flags: <defaults>
</compile_context>

<pallas_src>
import math

import jax
import jax.numpy as jnp
from jax.experimental import pallas as pl
from jax.experimental.pallas import tpu as pltpu


def _round_up(x, m):
    return ((x + m - 1) // m) * m


def _pick_tk(k_pad, cap=1536):
    """Largest multiple of 128 that divides k_pad and is <= cap (>=128)."""
    best = 128
    t = 128
    while t <= min(k_pad, cap):
        if k_pad % t == 0:
            best = t
        t += 128
    return best


def _equal_conv2d_matmul_kernel(a_ref, w_ref, b_ref, o_ref, acc_ref):
    """One (tm, tn) output tile; reduction over grid axis 2 (K strips)."""
    k = pl.program_id(2)

    @pl.when(k == 0)
    def _():
        acc_ref[...] = jnp.zeros_like(acc_ref)

    # bf16 x bf16 -> f32 accumulate, default precision (single-pass MXU).
    acc_ref[...] += jnp.dot(
        a_ref[...], w_ref[...], preferred_element_type=jnp.float32)

    @pl.when(k == pl.num_programs(2) - 1)
    def _():
        # Equalized-LR scale is already folded into the weights; only the
        # bias add remains in the epilogue.
        o_ref[...] = (acc_ref[...] + b_ref[...]).astype(o_ref.dtype)


def equal_conv2d(x, weight, bias=None, *, stride=1, padding=0,
                 compute_dtype=jnp.bfloat16, channels_last_output=False):
    """EqualConv2d forward. x: (B, Cin, H, W); weight: (Cout, Cin, K, K)."""
    B, Cin, H, W = x.shape
    Cout, Cin_w, K, K2 = weight.shape
    assert Cin_w == Cin and K == K2
    out_dtype = x.dtype

    scale = 1.0 / math.sqrt(Cin * K * K)
    w_scaled = weight.astype(jnp.float32) * scale     # fold scale once (tiny)
    if bias is None:
        bias = jnp.zeros((Cout,), dtype=jnp.float32)

    # Pad + single NHWC transpose of the un-expanded input, cast to bf16 early
    # so the K*K im2col slices (and their HBM traffic) are half-width.
    xp = jnp.pad(x, ((0, 0), (0, 0), (padding, padding), (padding, padding)))
    xp = xp.transpose(0, 2, 3, 1).astype(compute_dtype)        # (B, Hp, Wp, Cin)
    Hp, Wp = H + 2 * padding, W + 2 * padding
    Hout = (Hp - K) // stride + 1
    Wout = (Wp - K) // stride + 1
    M = B * Hout * Wout
    Ktot = Cin * K * K

    # Tile sizes: lane-dense, (8,128)-aligned; tk divides K_pad exactly.
    tm = min(512, _round_up(M, 8))
    M_pad = _round_up(M, tm)
    tn = min(512, _round_up(Cout, 128))
    N_pad = _round_up(Cout, tn)
    K_pad = _round_up(Ktot, 128)
    tk = _pick_tk(K_pad, cap=1536)

    # im2col: (kh, kw, Cin) minor order; K-axis zero pad folded into the concat.
    cols = []
    for kh in range(K):
        for kw in range(K):
            cols.append(xp[:, kh:kh + stride * Hout:stride,
                           kw:kw + stride * Wout:stride, :])
    if K_pad > Ktot:
        cols.append(jnp.zeros((B, Hout, Wout, K_pad - Ktot), compute_dtype))
    patches = jnp.concatenate(cols, axis=-1).reshape(M, K_pad)
    if M_pad > M:
        patches = jnp.pad(patches, ((0, M_pad - M), (0, 0)))

    # Weight matrix in matching (kh, kw, Cin) row order.
    w_mat = w_scaled.transpose(2, 3, 1, 0).reshape(Ktot, Cout)
    w_mat = jnp.pad(w_mat.astype(compute_dtype),
                    ((0, K_pad - Ktot), (0, N_pad - Cout)))
    b_mat = jnp.pad(bias.astype(jnp.float32).reshape(1, Cout),
                    ((0, 0), (0, N_pad - Cout)))

    grid = (M_pad // tm, N_pad // tn, K_pad // tk)

    # VMEM footprint: double-buffered A/W + out tiles, f32 acc, bias row.
    in_isz = jnp.dtype(compute_dtype).itemsize
    out_isz = jnp.dtype(out_dtype).itemsize
    vmem_bytes = (2 * (tm * tk + tk * tn) * in_isz
                  + tm * tn * 4 + 2 * tm * tn * out_isz + 2 * tn * 4)
    vmem_limit = min(max(vmem_bytes + (4 << 20), 16 << 20), 48 << 20)

    out = pl.pallas_call(
        _equal_conv2d_matmul_kernel,
        out_shape=jax.ShapeDtypeStruct((M_pad, N_pad), out_dtype),
        grid=grid,
        in_specs=[
            pl.BlockSpec((tm, tk), lambda i, j, k: (i, k)),   # patches tile
            pl.BlockSpec((tk, tn), lambda i, j, k: (k, j)),   # weight tile
            pl.BlockSpec((1, tn), lambda i, j, k: (0, j)),    # bias row
        ],
        out_specs=pl.BlockSpec((tm, tn), lambda i, j, k: (i, j)),
        scratch_shapes=[pltpu.VMEM((tm, tn), jnp.float32)],
        compiler_params=pltpu.CompilerParams(
            dimension_semantics=("parallel", "parallel", "arbitrary"),
            vmem_limit_bytes=int(vmem_limit),
        ),
    )(patches, w_mat, b_mat)

    out = out[:M, :Cout].reshape(B, Hout, Wout, Cout)
    if channels_last_output:
        return out                                   # (B, Hout, Wout, Cout)
    return out.transpose(0, 3, 1, 2)                 # (B, Cout, Hout, Wout)


if __name__ == "__main__":
    key = jax.random.PRNGKey(0)
    k_x, k_w, k_b = jax.random.split(key, 3)

    B, Cin, Cout, H, W, K = 2, 4, 8, 16, 16, 3
    x = jax.random.normal(k_x, (B, Cin, H, W), dtype=jnp.float32)
    weight = jax.random.normal(k_w, (Cout, Cin, K, K), dtype=jnp.float32)
    bias = jax.random.normal(k_b, (Cout,), dtype=jnp.float32)
    scale = 1.0 / math.sqrt(Cin * K * K)

    # bf16 compute vs f32 reference -> loosened tolerance.
    TOL = dict(atol=3e-2, rtol=3e-2)

    # Case 1: stride=1, padding=1, with bias.
    out = jax.block_until_ready(equal_conv2d(x, weight, bias, stride=1, padding=1))
    ref = jax.lax.conv_general_dilated(
        x, weight * scale, window_strides=(1, 1), padding=[(1, 1), (1, 1)],
        dimension_numbers=("NCHW", "OIHW", "NCHW"),
        precision=jax.lax.Precision.HIGHEST,
    ) + bias.reshape(1, Cout, 1, 1)
    assert out.shape == (B, Cout, H, W), out.shape
    assert jnp.allclose(out, ref, **TOL), float(jnp.max(jnp.abs(out - ref)))

    # Case 2: no bias, stride=2, no padding.
    out2 = jax.block_until_ready(equal_conv2d(x, weight, None, stride=2, padding=0))
    ref2 = jax.lax.conv_general_dilated(
        x, weight * scale, window_strides=(2, 2), padding=[(0, 0), (0, 0)],
        dimension_numbers=("NCHW", "OIHW", "NCHW"),
        precision=jax.lax.Precision.HIGHEST)
    assert out2.shape == ref2.shape, (out2.shape, ref2.shape)
    assert jnp.allclose(out2, ref2, **TOL), float(jnp.max(jnp.abs(out2 - ref2)))

    print("KERNEL_OK")
</pallas_src>

<mosaic_0001>
module attributes {stable_mosaic.version = 11 : i64} {
  func.func @_equal_conv2d_matmul_kernel(%arg0: i32, %arg1: i32, %arg2: i32, %arg3: memref<512x128xbf16, #tpu.memory_space<vmem>>, %arg4: memref<128x128xbf16, #tpu.memory_space<vmem>>, %arg5: memref<1x128xf32, #tpu.memory_space<vmem>>, %arg6: memref<512x128xf32, #tpu.memory_space<vmem>>, %arg7: memref<512x128xf32, #tpu.memory_space<vmem>>) attributes {dimension_semantics = [#tpu.dimension_semantics<parallel>, #tpu.dimension_semantics<parallel>, #tpu.dimension_semantics<arbitrary>], iteration_bounds = array<i64: 1, 1, 1>, scalar_prefetch = 0 : i64, scratch_operands = 1 : i64, tpu.core_type = #tpu.core_type<tc>, window_params = [{transform_indices = @transform_0, window_bounds = array<i64: 512, 128>}, {transform_indices = @transform_1, window_bounds = array<i64: 128, 128>}, {transform_indices = @transform_2, window_bounds = array<i64: 1, 128>}, {transform_indices = @transform_3, window_bounds = array<i64: 512, 128>}]} {
    %c0_i32 = arith.constant 0 : i32
    %0 = arith.cmpi eq, %arg2, %c0_i32 : i32
    %1 = arith.extui %0 : i1 to i32
    %c0_i32_0 = arith.constant 0 : i32
    %2 = arith.cmpi ne, %1, %c0_i32_0 : i32
    scf.if %2 {
      %cst_10 = arith.constant 0.000000e+00 : f32
      %12 = vector.broadcast %cst_10 : f32 to vector<512x128xf32>
      %c0_11 = arith.constant 0 : index
      %c0_12 = arith.constant 0 : index
      %13 = vector.load %arg7[%c0_11, %c0_12] : memref<512x128xf32, #tpu.memory_space<vmem>>, vector<512x128xf32>
      tpu.vector_store %arg7[%c0_11, %c0_12], %12 {strides = array<i32>} : memref<512x128xf32, #tpu.memory_space<vmem>>, vector<512x128xf32>,
    } else {
    }
    %c0 = arith.constant 0 : index
    %c0_1 = arith.constant 0 : index
    %3 = vector.load %arg7[%c0, %c0_1] : memref<512x128xf32, #tpu.memory_space<vmem>>, vector<512x128xf32>
    %c0_2 = arith.constant 0 : index
    %c0_3 = arith.constant 0 : index
    %4 = vector.load %arg3[%c0_2, %c0_3] : memref<512x128xbf16, #tpu.memory_space<vmem>>, vector<512x128xbf16>
    %c0_4 = arith.constant 0 : index
    %c0_5 = arith.constant 0 : index
    %5 = vector.load %arg4[%c0_4, %c0_5] : memref<128x128xbf16, #tpu.memory_space<vmem>>, vector<128x128xbf16>
    %cst = arith.constant dense<0.000000e+00> : vector<512x128xf32>
    %6 = tpu.matmul %4, %5, %cst {dimension_numbers = #tpu.dot_dimension_numbers<[1], [0], [0], [1], [0, 0, 1, 1], [], []>} : vector<512x128xbf16>, vector<128x128xbf16>, vector<512x128xf32> -> vector<512x128xf32>
    %7 = arith.addf %3, %6 : vector<512x128xf32>
    %c0_6 = arith.constant 0 : index
    %c0_7 = arith.constant 0 : index
    %8 = vector.load %arg7[%c0_6, %c0_7] : memref<512x128xf32, #tpu.memory_space<vmem>>, vector<512x128xf32>
    tpu.vector_store %arg7[%c0_6, %c0_7], %7 {strides = array<i32>} : memref<512x128xf32, #tpu.memory_space<vmem>>, vector<512x128xf32>,
    %c0_i32_8 = arith.constant 0 : i32
    %9 = arith.cmpi eq, %arg2, %c0_i32_8 : i32
    %10 = arith.extui %9 : i1 to i32
    %c0_i32_9 = arith.constant 0 : i32
    %11 = arith.cmpi ne, %10, %c0_i32_9 : i32
    scf.if %11 {
      %c0_10 = arith.constant 0 : index
      %c0_11 = arith.constant 0 : index
      %12 = vector.load %arg7[%c0_10, %c0_11] : memref<512x128xf32, #tpu.memory_space<vmem>>, vector<512x128xf32>
      %c0_12 = arith.constant 0 : index
      %c0_13 = arith.constant 0 : index
      %13 = vector.load %arg5[%c0_12, %c0_13] : memref<1x128xf32, #tpu.memory_space<vmem>>, vector<1x128xf32>
      %14 = vector.broadcast %13 : vector<1x128xf32> to vector<512x128xf32>
      %15 = arith.addf %12, %14 : vector<512x128xf32>
      %c0_14 = arith.constant 0 : index
      %c0_15 = arith.constant 0 : index
      %16 = vector.load %arg6[%c0_14, %c0_15] : memref<512x128xf32, #tpu.memory_space<vmem>>, vector<512x128xf32>
      tpu.vector_store %arg6[%c0_14, %c0_15], %15 {strides = array<i32>} : memref<512x128xf32, #tpu.memory_space<vmem>>, vector<512x128xf32>,
    } else {
    }
    return
  }
  func.func @transform_0(%arg0: i32, %arg1: i32, %arg2: i32) -> (i32, i32) {
    %c0_i32 = arith.constant 0 : i32
    return %arg0, %arg2 : i32, i32
  }
  func.func @transform_1(%arg0: i32, %arg1: i32, %arg2: i32) -> (i32, i32) {
    %c0_i32 = arith.constant 0 : i32
    return %arg2, %arg1 : i32, i32
  }
  func.func @transform_2(%arg0: i32, %arg1: i32, %arg2: i32) -> (i32, i32) {
    %c0_i32 = arith.constant 0 : i32
    %c0_i32_0 = arith.constant 0 : i32
    return %c0_i32, %arg1 : i32, i32
  }
  func.func @transform_3(%arg0: i32, %arg1: i32, %arg2: i32) -> (i32, i32) {
    %c0_i32 = arith.constant 0 : i32
    return %arg0, %arg1 : i32, i32
  }
}

</mosaic_0001>

<bundles_post_ra>
// kernel: tpu_custom_call.1
= control target key start
LH: loop header
LB: loop body
LE: loop exit
PB: predicated region body
PF: predicated region fallthrough
CT: control target
= control target key end

     0   :  { %8 = vsyncpa [#allocation4], 0  ;;  %s1430_s0 = inlined_call_operand.hbm [shape: bf16[512,128], index: 0, kind: input, shape index: {}]   ;;  %s1431_s1 = inlined_call_operand.hbm [shape: bf16[128,128], index: 1, kind: input, shape index: {}]   ;;  %s1432_s2 = inlined_call_operand.vmem [shape: f32[1,128], index: 2, kind: input, shape index: {}]   ;;  %s1433_s3 = inlined_call_operand.hbm [shape: f32[512,128], index: 3, kind: output, shape index: {}]  }
   0x1   :  { %9 = vsyncpa [#allocation7], 0 }
   0x2   :  { %10 = vsyncpa [#allocation5], 0  ;;  %s15_s14 = sshll.u32 %s1430_s0, 4  ;;  %s1325_s15 = smov [#allocation3]   ;;  %s16_s14 = int_to_ptr.hbm [resolvable:$true] %s15_s14 }
   0x3   :  { %s17_s16 = sshll.u32 %s1325_s15, 4  ;;  %s28_s19 = sshll.u32 %s1431_s1, 4  ;;  %s18_s16 = int_to_ptr.vmem [resolvable:$true] %s17_s16  ;;  %s29_s19 = int_to_ptr.hbm [resolvable:$true] %s28_s19 }
   0x4   :  { %s1326_s20 = smov 64   ;;  %s1327_s21 = smov 4  }
   0x5   :  { %23 = dma.hbm_to_vmem [thread:$0]  %s16_s14, 4096, %s18_s16, [#allocation4], %s1326_s20, %s1326_s20, %s1327_s21  }
   0x6   :  { %s1328_s22 = smov [#allocation6]  }
   0x7   :  { %s30_s23 = sshll.u32 %s1328_s22, 4  ;;  %s31_s23 = int_to_ptr.vmem [resolvable:$true] %s30_s23 }
   0x8   :  { %36 = dma.hbm_to_vmem [thread:$0]  %s29_s19, 1024, %s31_s23, [#allocation7], %s1326_s20, %s1326_s20, %s1327_s21  }
   0x9   :  { %1319 = dma.done.wait [#allocation4], 4096  }
   0xa   :  { %1320 = vsyncadd [#allocation4], 4294963200 }
   0xb   :  { %1321 = dma.done.wait [#allocation7], 1024  }
   0xc   :  { %1322 = vsyncadd [#allocation7], 4294966272  ;;  %v1214_v0 = vld [vmem:[#allocation6 + $0x38] sm:$0xff]  ;;  %v1213_v1 = vld [vmem:[#allocation6 + $0x30] sm:$0xff]  ;;  %s1001_s27 = sshll.u32 %s1433_s3, 4  ;;  %s1330_s28 = smov 128   ;;  %s1002_s27 = int_to_ptr.hbm [resolvable:$true] %s1001_s27 }
   0xd   :  { %499 = vmatpush.bf16.msra.mxu0 %v1214_v0  ;;  %1215 = vmatpush.bf16.msra.mxu1 %v1214_v0  ;;  %v1212_v2 = vld [vmem:[#allocation6 + $0x28] sm:$0xff]  ;;  %v1211_v3 = vld [vmem:[#allocation6 + $0x20] sm:$0xff]  ;;  %v1210_v4 = vld [vmem:[#allocation6 + $0x18] sm:$0xff]  ;;  %s1331_s29 = smov 8  }
   0xe   :  { %1216 = vmatpush.bf16.msra.mxu2 %v1214_v0  ;;  %1217 = vmatpush.bf16.msra.mxu3 %v1214_v0  ;;  %v1209_v5 = vld [vmem:[#allocation6 + $0x10] sm:$0xff]  ;;  %v1208_v6 = vld [vmem:[#allocation6 + $0x8] sm:$0xff]  ;;  %v1207_v7 = vld [vmem:[#allocation6] sm:$0xff] }
   0xf   :  { %v1175_v8 = vld [vmem:[#allocation3] sm:$0xff]  ;;  %v1176_v12 = vld [vmem:[#allocation3 + $0x8] sm:$0xff]  ;;  %v1177_v16 = vld [vmem:[#allocation3 + $0x10] sm:$0xff] }
  0x10   :  { %v1183_v9 = vld [vmem:[#allocation3 + $0x40] sm:$0xff]  ;;  %v1184_v13 = vld [vmem:[#allocation3 + $0x48] sm:$0xff]  ;;  %v1185_v17 = vld [vmem:[#allocation3 + $0x50] sm:$0xff] }
  0x11   :  { %500 = vmatpush.bf16.msra.mxu0 %v1213_v1  ;;  %1218 = vmatpush.bf16.msra.mxu1 %v1213_v1  ;;  %v1191_v10 = vld [vmem:[#allocation3 + $0x80] sm:$0xff]  ;;  %v1192_v14 = vld [vmem:[#allocation3 + $0x88] sm:$0xff]  ;;  %v1193_v18 = vld [vmem:[#allocation3 + $0x90] sm:$0xff] }
  0x12   :  { %1219 = vmatpush.bf16.msra.mxu2 %v1213_v1  ;;  %1220 = vmatpush.bf16.msra.mxu3 %v1213_v1  ;;  %v1199_v11 = vld [vmem:[#allocation3 + $0xc0] sm:$0xff]  ;;  %v1200_v15 = vld [vmem:[#allocation3 + $0xc8] sm:$0xff]  ;;  %v1201_v19 = vld [vmem:[#allocation3 + $0xd0] sm:$0xff] }
  0x13   :  { %v1178_v20 = vld [vmem:[#allocation3 + $0x18] sm:$0xff]  ;;  %v1179_v24 = vld [vmem:[#allocation3 + $0x20] sm:$0xff]  ;;  %v1180_v28 = vld [vmem:[#allocation3 + $0x28] sm:$0xff] }
  0x14   :  { %v1186_v21 = vld [vmem:[#allocation3 + $0x58] sm:$0xff]  ;;  %v1187_v25 = vld [vmem:[#allocation3 + $0x60] sm:$0xff]  ;;  %v1188_v29 = vld [vmem:[#allocation3 + $0x68] sm:$0xff] }
  0x15   :  { %501 = vmatpush.bf16.msra.mxu0 %v1212_v2  ;;  %1221 = vmatpush.bf16.msra.mxu1 %v1212_v2  ;;  %v1194_v22 = vld [vmem:[#allocation3 + $0x98] sm:$0xff]  ;;  %v1195_v26 = vld [vmem:[#allocation3 + $0xa0] sm:$0xff]  ;;  %v1196_v30 = vld [vmem:[#allocation3 + $0xa8] sm:$0xff] }
  0x16   :  { %1222 = vmatpush.bf16.msra.mxu2 %v1212_v2  ;;  %1223 = vmatpush.bf16.msra.mxu3 %v1212_v2  ;;  %v1202_v23 = vld [vmem:[#allocation3 + $0xd8] sm:$0xff]  ;;  %v1203_v27 = vld [vmem:[#allocation3 + $0xe0] sm:$0xff]  ;;  %v1204_v31 = vld [vmem:[#allocation3 + $0xe8] sm:$0xff] }
  0x17   :  { %v1181_v32 = vld [vmem:[#allocation3 + $0x30] sm:$0xff]  ;;  %v1182_v36 = vld [vmem:[#allocation3 + $0x38] sm:$0xff]  ;;  %v1361_v40 = vld [vmem:[%s1432_s2] ss:$0 sm:$0xff]  ;;  %s1329_s2 = smov [#allocation8]  }
  0x18   :  { %v1189_v33 = vld [vmem:[#allocation3 + $0x70] sm:$0xff]  ;;  %v1190_v37 = vld [vmem:[#allocation3 + $0x78] sm:$0xff]  ;;  %s999_s24 = sshll.u32 %s1329_s2, 4  ;;  %s1000_s24 = int_to_ptr.vmem [resolvable:$true] %s999_s24 }
  0x19   :  { %502 = vmatpush.bf16.msra.mxu0 %v1211_v3  ;;  %1224 = vmatpush.bf16.msra.mxu1 %v1211_v3  ;;  %v1197_v34 = vld [vmem:[#allocation3 + $0xb0] sm:$0xff]  ;;  %v1198_v38 = vld [vmem:[#allocation3 + $0xb8] sm:$0xff] }
  0x1a   :  { %1225 = vmatpush.bf16.msra.mxu2 %v1211_v3  ;;  %1226 = vmatpush.bf16.msra.mxu3 %v1211_v3  ;;  %v1205_v35 = vld [vmem:[#allocation3 + $0xf0] sm:$0xff]  ;;  %v1206_v39 = vld [vmem:[#allocation3 + $0xf8] sm:$0xff] }
  0x1d   :  { %503 = vmatpush.bf16.msra.mxu0 %v1210_v4  ;;  %1227 = vmatpush.bf16.msra.mxu1 %v1210_v4 }
  0x1e   :  { %1228 = vmatpush.bf16.msra.mxu2 %v1210_v4  ;;  %1229 = vmatpush.bf16.msra.mxu3 %v1210_v4 }
  0x21   :  { %504 = vmatpush.bf16.msra.mxu0 %v1209_v5  ;;  %1230 = vmatpush.bf16.msra.mxu1 %v1209_v5 }
  0x22   :  { %1231 = vmatpush.bf16.msra.mxu2 %v1209_v5  ;;  %1232 = vmatpush.bf16.msra.mxu3 %v1209_v5 }
  0x25   :  { %505 = vmatpush.bf16.msra.mxu0 %v1208_v6  ;;  %1233 = vmatpush.bf16.msra.mxu1 %v1208_v6 }
  0x26   :  { %1234 = vmatpush.bf16.msra.mxu2 %v1208_v6  ;;  %1235 = vmatpush.bf16.msra.mxu3 %v1208_v6 }
  0x29   :  { %506 = vmatpush.bf16.msra.mxu0 %v1207_v7  ;;  %1236 = vmatpush.bf16.msra.mxu1 %v1207_v7 }
  0x2a   :  { %1237 = vmatpush.bf16.msra.mxu2 %v1207_v7  ;;  %1238 = vmatpush.bf16.msra.mxu3 %v1207_v7 }
  0x2c   :  { %507 = vmatmul.bf16.vlgmr.msra.gmra.mxu0 %v1175_v8  ;;  %547 = vmatmul.bf16.vlgmr.msra.gmra.mxu1 %v1183_v9 }
  0x2d   :  { %587 = vmatmul.bf16.vlgmr.msra.gmra.mxu2 %v1191_v10  ;;  %627 = vmatmul.bf16.vlgmr.msra.gmra.mxu3 %v1199_v11 }
  0x3c   :  { %512 = vmatmul.bf16.gmra.mxu0 %v1176_v12  ;;  %552 = vmatmul.bf16.gmra.mxu1 %v1184_v13 }
  0x3d   :  { %592 = vmatmul.bf16.gmra.mxu2 %v1192_v14  ;;  %632 = vmatmul.bf16.gmra.mxu3 %v1200_v15 }
  0x4c   :  { %517 = vmatmul.bf16.gmra.mxu0 %v1177_v16  ;;  %557 = vmatmul.bf16.gmra.mxu1 %v1185_v17 }
  0x4d   :  { %597 = vmatmul.bf16.gmra.mxu2 %v1193_v18  ;;  %637 = vmatmul.bf16.gmra.mxu3 %v1201_v19 }
  0x5c   :  { %522 = vmatmul.bf16.gmra.mxu0 %v1178_v20  ;;  %562 = vmatmul.bf16.gmra.mxu1 %v1186_v21 }
  0x5d   :  { %602 = vmatmul.bf16.gmra.mxu2 %v1194_v22  ;;  %642 = vmatmul.bf16.gmra.mxu3 %v1202_v23 }
  0x6c   :  { %527 = vmatmul.bf16.gmra.mxu0 %v1179_v24  ;;  %567 = vmatmul.bf16.gmra.mxu1 %v1187_v25 }
  0x6d   :  { %607 = vmatmul.bf16.gmra.mxu2 %v1195_v26  ;;  %647 = vmatmul.bf16.gmra.mxu3 %v1203_v27 }
  0x7c   :  { %532 = vmatmul.bf16.gmra.mxu0 %v1180_v28  ;;  %572 = vmatmul.bf16.gmra.mxu1 %v1188_v29 }
  0x7d   :  { %612 = vmatmul.bf16.gmra.mxu2 %v1196_v30  ;;  %652 = vmatmul.bf16.gmra.mxu3 %v1204_v31 }
  0x8c   :  { %537 = vmatmul.bf16.gmra.mxu0 %v1181_v32  ;;  %577 = vmatmul.bf16.gmra.mxu1 %v1189_v33 }
  0x8d   :  { %617 = vmatmul.bf16.gmra.mxu2 %v1197_v34  ;;  %657 = vmatmul.bf16.gmra.mxu3 %v1205_v35 }
  0x9c   :  { %542 = vmatmul.bf16.gmra.mxu0 %v1182_v36  ;;  %582 = vmatmul.bf16.gmra.mxu1 %v1190_v37 }
  0x9d   :  { %622 = vmatmul.bf16.gmra.mxu2 %v1198_v38  ;;  %662 = vmatmul.bf16.gmra.mxu3 %v1206_v39 }
  0xa9   :  { %v508_v41 = vpop.f32.mrf.mxu0  ;;  %v548_v42 = vpop.f32.mrf.mxu1 }
  0xaa   :  { %v867_v43 = vadd.f32 %v1361_v40, %v508_v41  ;;  %v883_v44 = vadd.f32 %v1361_v40, %v548_v42 }
  0xac   :  { %931 = vst [vmem:[#allocation8] sm:$0xff] %v867_v43 }
  0xad   :  { %947 = vst [vmem:[#allocation8 + $0x80] sm:$0xff] %v883_v44 }
  0xb0   :  { %v588_v45 = vpop.f32.mrf.mxu2  ;;  %v628_v46 = vpop.f32.mrf.mxu3 }
  0xb1   :  { %v899_v47 = vadd.f32 %v1361_v40, %v588_v45  ;;  %v915_v48 = vadd.f32 %v1361_v40, %v628_v46  ;;  %v510_v49 = vpop.f32.mrf.mxu0  ;;  %v550_v50 = vpop.f32.mrf.mxu1 }
  0xb2   :  { %v868_v51 = vadd.f32 %v1361_v40, %v510_v49  ;;  %v884_v52 = vadd.f32 %v1361_v40, %v550_v50 }
  0xb3   :  { %963 = vst [vmem:[#allocation8 + $0x100] sm:$0xff] %v899_v47 }
  0xb4   :  { %979 = vst [vmem:[#allocation8 + $0x180] sm:$0xff] %v915_v48 }
  0xb5   :  { %932 = vst [vmem:[#allocation8 + $0x8] sm:$0xff] %v868_v51 }
  0xb6   :  { %948 = vst [vmem:[#allocation8 + $0x88] sm:$0xff] %v884_v52 }
  0xb8   :  { %v590_v53 = vpop.f32.mrf.mxu2  ;;  %v630_v54 = vpop.f32.mrf.mxu3 }
  0xb9   :  { %v900_v55 = vadd.f32 %v1361_v40, %v590_v53  ;;  %v916_v56 = vadd.f32 %v1361_v40, %v630_v54  ;;  %v513_v57 = vpop.f32.mrf.mxu0  ;;  %v553_v58 = vpop.f32.mrf.mxu1 }
  0xba   :  { %v869_v59 = vadd.f32 %v1361_v40, %v513_v57  ;;  %v885_v60 = vadd.f32 %v1361_v40, %v553_v58 }
  0xbb   :  { %964 = vst [vmem:[#allocation8 + $0x108] sm:$0xff] %v900_v55 }
  0xbc   :  { %980 = vst [vmem:[#allocation8 + $0x188] sm:$0xff] %v916_v56 }
  0xbd   :  { %933 = vst [vmem:[#allocation8 + $0x10] sm:$0xff] %v869_v59 }
  0xbe   :  { %949 = vst [vmem:[#allocation8 + $0x90] sm:$0xff] %v885_v60 }
  0xc0   :  { %v593_v61 = vpop.f32.mrf.mxu2  ;;  %v633_v62 = vpop.f32.mrf.mxu3 }
  0xc1   :  { %v901_v63 = vadd.f32 %v1361_v40, %v593_v61  ;;  %v917_v0 = vadd.f32 %v1361_v40, %v633_v62  ;;  %v515_v1 = vpop.f32.mrf.mxu0  ;;  %v555_v2 = vpop.f32.mrf.mxu1 }
  0xc2   :  { %v870_v3 = vadd.f32 %v1361_v40, %v515_v1  ;;  %v886_v4 = vadd.f32 %v1361_v40, %v555_v2 }
  0xc3   :  { %965 = vst [vmem:[#allocation8 + $0x110] sm:$0xff] %v901_v63 }
  0xc4   :  { %981 = vst [vmem:[#allocation8 + $0x190] sm:$0xff] %v917_v0 }
  0xc5   :  { %934 = vst [vmem:[#allocation8 + $0x18] sm:$0xff] %v870_v3 }
  0xc6   :  { %950 = vst [vmem:[#allocation8 + $0x98] sm:$0xff] %v886_v4 }
  0xc8   :  { %v595_v5 = vpop.f32.mrf.mxu2  ;;  %v635_v6 = vpop.f32.mrf.mxu3 }
  0xc9   :  { %v902_v7 = vadd.f32 %v1361_v40, %v595_v5  ;;  %v918_v8 = vadd.f32 %v1361_v40, %v635_v6  ;;  %v518_v9 = vpop.f32.mrf.mxu0  ;;  %v558_v10 = vpop.f32.mrf.mxu1 }
  0xca   :  { %v871_v11 = vadd.f32 %v1361_v40, %v518_v9  ;;  %v887_v12 = vadd.f32 %v1361_v40, %v558_v10 }
  0xcb   :  { %966 = vst [vmem:[#allocation8 + $0x118] sm:$0xff] %v902_v7 }
  0xcc   :  { %982 = vst [vmem:[#allocation8 + $0x198] sm:$0xff] %v918_v8 }
  0xcd   :  { %935 = vst [vmem:[#allocation8 + $0x20] sm:$0xff] %v871_v11 }
  0xce   :  { %951 = vst [vmem:[#allocation8 + $0xa0] sm:$0xff] %v887_v12 }
  0xd0   :  { %v598_v13 = vpop.f32.mrf.mxu2  ;;  %v638_v14 = vpop.f32.mrf.mxu3 }
  0xd1   :  { %v903_v15 = vadd.f32 %v1361_v40, %v598_v13  ;;  %v919_v16 = vadd.f32 %v1361_v40, %v638_v14  ;;  %v520_v17 = vpop.f32.mrf.mxu0  ;;  %v560_v18 = vpop.f32.mrf.mxu1 }
  0xd2   :  { %v872_v19 = vadd.f32 %v1361_v40, %v520_v17  ;;  %v888_v20 = vadd.f32 %v1361_v40, %v560_v18 }
  0xd3   :  { %967 = vst [vmem:[#allocation8 + $0x120] sm:$0xff] %v903_v15 }
  0xd4   :  { %983 = vst [vmem:[#allocation8 + $0x1a0] sm:$0xff] %v919_v16 }
  0xd5   :  { %936 = vst [vmem:[#allocation8 + $0x28] sm:$0xff] %v872_v19 }
  0xd6   :  { %952 = vst [vmem:[#allocation8 + $0xa8] sm:$0xff] %v888_v20 }
  0xd8   :  { %v600_v21 = vpop.f32.mrf.mxu2  ;;  %v640_v22 = vpop.f32.mrf.mxu3 }
  0xd9   :  { %v904_v23 = vadd.f32 %v1361_v40, %v600_v21  ;;  %v920_v24 = vadd.f32 %v1361_v40, %v640_v22  ;;  %v523_v25 = vpop.f32.mrf.mxu0  ;;  %v563_v26 = vpop.f32.mrf.mxu1 }
  0xda   :  { %v873_v27 = vadd.f32 %v1361_v40, %v523_v25  ;;  %v889_v28 = vadd.f32 %v1361_v40, %v563_v26 }
  0xdb   :  { %968 = vst [vmem:[#allocation8 + $0x128] sm:$0xff] %v904_v23 }
  0xdc   :  { %984 = vst [vmem:[#allocation8 + $0x1a8] sm:$0xff] %v920_v24 }
  0xdd   :  { %937 = vst [vmem:[#allocation8 + $0x30] sm:$0xff] %v873_v27 }
  0xde   :  { %953 = vst [vmem:[#allocation8 + $0xb0] sm:$0xff] %v889_v28 }
  0xe0   :  { %v603_v29 = vpop.f32.mrf.mxu2  ;;  %v643_v30 = vpop.f32.mrf.mxu3 }
  0xe1   :  { %v905_v31 = vadd.f32 %v1361_v40, %v603_v29  ;;  %v921_v32 = vadd.f32 %v1361_v40, %v643_v30  ;;  %v525_v33 = vpop.f32.mrf.mxu0  ;;  %v565_v34 = vpop.f32.mrf.mxu1 }
  0xe2   :  { %v874_v35 = vadd.f32 %v1361_v40, %v525_v33  ;;  %v890_v36 = vadd.f32 %v1361_v40, %v565_v34 }
  0xe3   :  { %969 = vst [vmem:[#allocation8 + $0x130] sm:$0xff] %v905_v31 }
  0xe4   :  { %985 = vst [vmem:[#allocation8 + $0x1b0] sm:$0xff] %v921_v32 }
  0xe5   :  { %938 = vst [vmem:[#allocation8 + $0x38] sm:$0xff] %v874_v35 }
  0xe6   :  { %954 = vst [vmem:[#allocation8 + $0xb8] sm:$0xff] %v890_v36 }
  0xe8   :  { %v605_v37 = vpop.f32.mrf.mxu2  ;;  %v645_v38 = vpop.f32.mrf.mxu3 }
  0xe9   :  { %v906_v39 = vadd.f32 %v1361_v40, %v605_v37  ;;  %v922_v41 = vadd.f32 %v1361_v40, %v645_v38  ;;  %v528_v42 = vpop.f32.mrf.mxu0  ;;  %v568_v43 = vpop.f32.mrf.mxu1 }
  0xea   :  { %v875_v44 = vadd.f32 %v1361_v40, %v528_v42  ;;  %v891_v45 = vadd.f32 %v1361_v40, %v568_v43 }
  0xeb   :  { %970 = vst [vmem:[#allocation8 + $0x138] sm:$0xff] %v906_v39 }
  0xec   :  { %986 = vst [vmem:[#allocation8 + $0x1b8] sm:$0xff] %v922_v41 }
  0xed   :  { %939 = vst [vmem:[#allocation8 + $0x40] sm:$0xff] %v875_v44 }
  0xee   :  { %955 = vst [vmem:[#allocation8 + $0xc0] sm:$0xff] %v891_v45 }
  0xf0   :  { %v608_v46 = vpop.f32.mrf.mxu2  ;;  %v648_v47 = vpop.f32.mrf.mxu3 }
  0xf1   :  { %v907_v48 = vadd.f32 %v1361_v40, %v608_v46  ;;  %v923_v49 = vadd.f32 %v1361_v40, %v648_v47  ;;  %v530_v50 = vpop.f32.mrf.mxu0  ;;  %v570_v51 = vpop.f32.mrf.mxu1 }
  0xf2   :  { %v876_v52 = vadd.f32 %v1361_v40, %v530_v50  ;;  %v892_v53 = vadd.f32 %v1361_v40, %v570_v51 }
  0xf3   :  { %971 = vst [vmem:[#allocation8 + $0x140] sm:$0xff] %v907_v48 }
  0xf4   :  { %987 = vst [vmem:[#allocation8 + $0x1c0] sm:$0xff] %v923_v49 }
  0xf5   :  { %940 = vst [vmem:[#allocation8 + $0x48] sm:$0xff] %v876_v52 }
  0xf6   :  { %956 = vst [vmem:[#allocation8 + $0xc8] sm:$0xff] %v892_v53 }
  0xf8   :  { %v610_v54 = vpop.f32.mrf.mxu2  ;;  %v650_v55 = vpop.f32.mrf.mxu3 }
  0xf9   :  { %v908_v56 = vadd.f32 %v1361_v40, %v610_v54  ;;  %v924_v57 = vadd.f32 %v1361_v40, %v650_v55  ;;  %v533_v58 = vpop.f32.mrf.mxu0  ;;  %v573_v59 = vpop.f32.mrf.mxu1 }
  0xfa   :  { %v877_v60 = vadd.f32 %v1361_v40, %v533_v58  ;;  %v893_v61 = vadd.f32 %v1361_v40, %v573_v59 }
  0xfb   :  { %972 = vst [vmem:[#allocation8 + $0x148] sm:$0xff] %v908_v56 }
  0xfc   :  { %988 = vst [vmem:[#allocation8 + $0x1c8] sm:$0xff] %v924_v57 }
  0xfd   :  { %941 = vst [vmem:[#allocation8 + $0x50] sm:$0xff] %v877_v60 }
  0xfe   :  { %957 = vst [vmem:[#allocation8 + $0xd0] sm:$0xff] %v893_v61 }
 0x100   :  { %v613_v62 = vpop.f32.mrf.mxu2  ;;  %v653_v63 = vpop.f32.mrf.mxu3 }
 0x101   :  { %v909_v0 = vadd.f32 %v1361_v40, %v613_v62  ;;  %v925_v1 = vadd.f32 %v1361_v40, %v653_v63  ;;  %v535_v2 = vpop.f32.mrf.mxu0  ;;  %v575_v3 = vpop.f32.mrf.mxu1 }
 0x102   :  { %v878_v4 = vadd.f32 %v1361_v40, %v535_v2  ;;  %v894_v5 = vadd.f32 %v1361_v40, %v575_v3 }
 0x103   :  { %973 = vst [vmem:[#allocation8 + $0x150] sm:$0xff] %v909_v0 }
 0x104   :  { %989 = vst [vmem:[#allocation8 + $0x1d0] sm:$0xff] %v925_v1 }
 0x105   :  { %942 = vst [vmem:[#allocation8 + $0x58] sm:$0xff] %v878_v4 }
 0x106   :  { %958 = vst [vmem:[#allocation8 + $0xd8] sm:$0xff] %v894_v5 }
 0x108   :  { %v615_v6 = vpop.f32.mrf.mxu2  ;;  %v655_v7 = vpop.f32.mrf.mxu3 }
 0x109   :  { %v910_v8 = vadd.f32 %v1361_v40, %v615_v6  ;;  %v926_v9 = vadd.f32 %v1361_v40, %v655_v7  ;;  %v538_v10 = vpop.f32.mrf.mxu0  ;;  %v578_v11 = vpop.f32.mrf.mxu1 }
 0x10a   :  { %v879_v12 = vadd.f32 %v1361_v40, %v538_v10  ;;  %v895_v13 = vadd.f32 %v1361_v40, %v578_v11 }
 0x10b   :  { %974 = vst [vmem:[#allocation8 + $0x158] sm:$0xff] %v910_v8 }
 0x10c   :  { %990 = vst [vmem:[#allocation8 + $0x1d8] sm:$0xff] %v926_v9 }
 0x10d   :  { %943 = vst [vmem:[#allocation8 + $0x60] sm:$0xff] %v879_v12 }
 0x10e   :  { %959 = vst [vmem:[#allocation8 + $0xe0] sm:$0xff] %v895_v13 }
 0x110   :  { %v618_v14 = vpop.f32.mrf.mxu2  ;;  %v658_v15 = vpop.f32.mrf.mxu3 }
 0x111   :  { %v911_v16 = vadd.f32 %v1361_v40, %v618_v14  ;;  %v927_v17 = vadd.f32 %v1361_v40, %v658_v15  ;;  %v540_v18 = vpop.f32.mrf.mxu0  ;;  %v580_v19 = vpop.f32.mrf.mxu1 }
 0x112   :  { %v880_v20 = vadd.f32 %v1361_v40, %v540_v18  ;;  %v896_v21 = vadd.f32 %v1361_v40, %v580_v19 }
 0x113   :  { %975 = vst [vmem:[#allocation8 + $0x160] sm:$0xff] %v911_v16 }
 0x114   :  { %991 = vst [vmem:[#allocation8 + $0x1e0] sm:$0xff] %v927_v17 }
 0x115   :  { %944 = vst [vmem:[#allocation8 + $0x68] sm:$0xff] %v880_v20 }
 0x116   :  { %960 = vst [vmem:[#allocation8 + $0xe8] sm:$0xff] %v896_v21 }
 0x118   :  { %v620_v22 = vpop.f32.mrf.mxu2  ;;  %v660_v23 = vpop.f32.mrf.mxu3 }
 0x119   :  { %v912_v24 = vadd.f32 %v1361_v40, %v620_v22  ;;  %v928_v25 = vadd.f32 %v1361_v40, %v660_v23  ;;  %v543_v26 = vpop.f32.mrf.mxu0  ;;  %v583_v27 = vpop.f32.mrf.mxu1 }
 0x11a   :  { %v881_v28 = vadd.f32 %v1361_v40, %v543_v26  ;;  %v897_v29 = vadd.f32 %v1361_v40, %v583_v27 }
 0x11b   :  { %976 = vst [vmem:[#allocation8 + $0x168] sm:$0xff] %v912_v24 }
 0x11c   :  { %992 = vst [vmem:[#allocation8 + $0x1e8] sm:$0xff] %v928_v25 }
 0x11d   :  { %945 = vst [vmem:[#allocation8 + $0x70] sm:$0xff] %v881_v28 }
 0x11e   :  { %961 = vst [vmem:[#allocation8 + $0xf0] sm:$0xff] %v897_v29 }
 0x120   :  { %v623_v30 = vpop.f32.mrf.mxu2  ;;  %v663_v31 = vpop.f32.mrf.mxu3 }
 0x121   :  { %v913_v32 = vadd.f32 %v1361_v40, %v623_v30  ;;  %v929_v33 = vadd.f32 %v1361_v40, %v663_v31  ;;  %v545_v34 = vpop.f32.mrf.mxu0  ;;  %v585_v35 = vpop.f32.mrf.mxu1 }
 0x122   :  { %v882_v36 = vadd.f32 %v1361_v40, %v545_v34  ;;  %v898_v37 = vadd.f32 %v1361_v40, %v585_v35 }
 0x123   :  { %977 = vst [vmem:[#allocation8 + $0x170] sm:$0xff] %v913_v32 }
 0x124   :  { %993 = vst [vmem:[#allocation8 + $0x1f0] sm:$0xff] %v929_v33 }
 0x125   :  { %946 = vst [vmem:[#allocation8 + $0x78] sm:$0xff] %v882_v36 }
 0x126   :  { %962 = vst [vmem:[#allocation8 + $0xf8] sm:$0xff] %v898_v37 }
 0x128   :  { %v625_v38 = vpop.f32.mrf.mxu2  ;;  %v665_v39 = vpop.f32.mrf.mxu3 }
 0x129   :  { %v914_v41 = vadd.f32 %v1361_v40, %v625_v38  ;;  %v930_v42 = vadd.f32 %v1361_v40, %v665_v39 }
 0x12b   :  { %978 = vst [vmem:[#allocation8 + $0x178] sm:$0xff] %v914_v41 }
 0x12c   :  { %994 = vst [vmem:[#allocation8 + $0x1f8] sm:$0xff] %v930_v42 }
 0x12d   :  { %1007 = dma.vmem_to_hbm [thread:$0]  %s1000_s24, 8192, %s1002_s27, [#allocation5], %s1330_s28, %s1330_s28, %s1331_s29  }
 0x12e   :  { %1323 = dma.done.wait [#allocation5], 8192  }
 0x12f   :  { %1324 = vsyncadd [#allocation5], 4294959104 }
 0x130   :  { %1012 = vsyncpa [#allocation4], 1 }
 0x131   :  { %1013 = vsyncpa [#allocation7], 1 }
 0x132   :  { %1014 = vsyncpa [#allocation5], 1 }

</bundles_post_ra>
